<compile_context>
chip_gen: v6e
topology: v6e:2x2x1
jax: 0.10.0
libtpu: 0.0.40
codegen_flags: <defaults>
</compile_context>

<pallas_src>
import functools
import math

import jax
import jax.numpy as jnp
from jax.experimental import pallas as pl
from jax.experimental.pallas import tpu as pltpu


def _round_up(x, m):
    return ((x + m - 1) // m) * m


def _vmem_limit_bytes():
    """~3/4 of physical VMEM (96 MiB on v5e/v6e, 48 MiB on v7x)."""
    try:
        cap = pltpu.get_tpu_info().vmem_capacity_bytes
    except Exception:
        cap = 128 * 1024 * 1024
    return int(cap) * 3 // 4


# ----------------------------------------------------------------------------
# Buffered(1) support probe (single-buffer constant weight blocks).
# ----------------------------------------------------------------------------
_BUFFERED_OK = None


def _buffered_const_supported():
    global _BUFFERED_OK
    if _BUFFERED_OK is None:
        try:
            spec = pl.BlockSpec((8, 128), lambda i: (0, 0),
                                pipeline_mode=pl.Buffered(1))
            w = jnp.ones((8, 128), jnp.float32)

            def _probe_kernel(w_ref, o_ref):
                o_ref[...] = w_ref[...] * 2.0

            out = pl.pallas_call(
                _probe_kernel,
                out_shape=jax.ShapeDtypeStruct((8, 128), jnp.float32),
                grid=(2,),
                in_specs=[spec],
                out_specs=pl.BlockSpec((8, 128), lambda i: (0, 0)),
            )(w)
            jax.block_until_ready(out)
            _BUFFERED_OK = True
        except Exception:
            _BUFFERED_OK = False
    return _BUFFERED_OK


def _const_spec(a):
    """Full-array block, constant index map -> single-buffered if supported."""
    nd = a.ndim
    idx = lambda *_: (0,) * nd
    if _buffered_const_supported():
        return pl.BlockSpec(a.shape, idx, pipeline_mode=pl.Buffered(1))
    return pl.BlockSpec(a.shape, idx)


def _layernorm(y, g, b, eps=1e-5):
    mu = jnp.mean(y, axis=-1, keepdims=True)
    var = jnp.mean((y - mu) ** 2, axis=-1, keepdims=True)
    return (y - mu) * jax.lax.rsqrt(var + eps) * g + b


# ----------------------------------------------------------------------------
# Kernel 1: fused QKV projection, lane-dense (tile, D) bf16 outputs.
# ----------------------------------------------------------------------------
def qkv_proj_kernel(x_ref, w_ref, b_ref, q_ref, k_ref, v_ref):
    x = x_ref[...]                                           # (tile, D) bf16
    D = x.shape[1]
    qkv = (jnp.dot(x, w_ref[...], preferred_element_type=jnp.float32)
           + b_ref[...])                                     # (tile, 3D) f32
    # q-scale (1/sqrt(dh)) already folded into w_ref/b_ref at prep time.
    q_ref[...] = qkv[:, :D].astype(jnp.bfloat16)
    k_ref[...] = qkv[:, D:2 * D].astype(jnp.bfloat16)
    v_ref[...] = qkv[:, 2 * D:].astype(jnp.bfloat16)


# ----------------------------------------------------------------------------
# Kernel 2: flash attention (online softmax over causal KV tiles) + out-proj +
#           LN + FFN + LN epilogue on the diagonal tile.
# ----------------------------------------------------------------------------
def attn_block_kernel(x_ref, q_ref, k_ref, v_ref,
                      w_out_ref, b_out_ref, ln1_g_ref, ln1_b_ref,
                      w1_ref, b1_ref, w2_ref, b2_ref, ln2_g_ref, ln2_b_ref,
                      o_ref, m_ref, l_ref, acc_ref, *, nhead):
    qi = pl.program_id(1)
    ki = pl.program_id(2)

    tq, D = q_ref.shape
    tkv = k_ref.shape[0]
    dh = D // nhead

    def split_heads(ref):                                    # (t, D)->(h, t, dh)
        t = ref[...]
        return jnp.transpose(t.reshape(t.shape[0], nhead, dh), (1, 0, 2))

    @pl.when(ki == 0)
    def _init():
        m_ref[...] = jnp.full_like(m_ref, -1e30)
        l_ref[...] = jnp.zeros_like(l_ref)
        acc_ref[...] = jnp.zeros_like(acc_ref)

    def _online_update(apply_mask):
        q = split_heads(q_ref)                               # (h, tq, dh) bf16
        k = split_heads(k_ref)                               # (h, tkv, dh) bf16
        v = split_heads(v_ref)                               # (h, tkv, dh) bf16
        s = jnp.einsum('hqd,hkd->hqk', q, k,
                       preferred_element_type=jnp.float32)   # (h, tq, tkv) f32
        if apply_mask:
            # Only the diagonal tile needs masking (ki == qi, tq == tkv), so a
            # local-index comparison is exactly the causal constraint; it also
            # masks any zero-padded key columns (which only live in this tile).
            row = jax.lax.broadcasted_iota(jnp.int32, (tq, tkv), 0)
            col = jax.lax.broadcasted_iota(jnp.int32, (tq, tkv), 1)
            s = jnp.where((col <= row)[None, :, :], s, -1e30)
        m_prev = m_ref[...]
        m_new = jnp.maximum(m_prev, jnp.max(s, axis=-1, keepdims=True))
        alpha = jnp.exp(m_prev - m_new)
        p = jnp.exp(s - m_new)
        l_ref[...] = alpha * l_ref[...] + jnp.sum(p, axis=-1, keepdims=True)
        acc_ref[...] = alpha * acc_ref[...] + jnp.einsum(
            'hqk,hkd->hqd', p.astype(jnp.bfloat16), v,
            preferred_element_type=jnp.float32)
        m_ref[...] = m_new

    # Off-diagonal causal tiles: fully unmasked (no iota/compare/select work).
    @pl.when(ki < qi)
    def _accumulate_unmasked():
        _online_update(apply_mask=False)

    # Diagonal tile: masked update + full epilogue. Steps with ki > qi are
    # dead: clamped K/V index maps issue no DMA and no branch fires.
    @pl.when(ki == qi)
    def _diag_and_finalize():
        _online_update(apply_mask=True)

        x = x_ref[...].astype(jnp.float32)                   # (tq, D) residual
        # Deferred softmax normalization via EUP reciprocal (~1e-3 rel. error;
        # use approx=False if bit-tight parity with a torch reference matters).
        inv_l = pl.reciprocal(l_ref[...], approx=True)
        ctx = acc_ref[...] * inv_l                           # (h, tq, dh) f32
        ctx = jnp.transpose(ctx, (1, 0, 2)).reshape(tq, D)   # merge heads (once per qi)
        attn = (jnp.dot(ctx.astype(jnp.bfloat16), w_out_ref[...],
                        preferred_element_type=jnp.float32) + b_out_ref[...])
        y = _layernorm(x + attn, ln1_g_ref[...], ln1_b_ref[...])
        # Fused FFN epilogue. For realistic dim_ff on v7x (64 MiB VMEM), split
        # this into its own pallas_call tiled over dim_ff instead.
        h1 = jnp.maximum(
            jnp.dot(y.astype(jnp.bfloat16), w1_ref[...],
                    preferred_element_type=jnp.float32) + b1_ref[...], 0.0)
        h2 = (jnp.dot(h1.astype(jnp.bfloat16), w2_ref[...],
                      preferred_element_type=jnp.float32) + b2_ref[...])
        y = _layernorm(y + h2, ln2_g_ref[...], ln2_b_ref[...])
        o_ref[...] = y.astype(o_ref.dtype)                   # bf16 residual stream


# ----------------------------------------------------------------------------
# Kernel 3: final LayerNorm + output Linear (lane-dense padded output).
# ----------------------------------------------------------------------------
def out_head_kernel(x_ref, g_ref, b_ref, w_ref, bias_ref, o_ref):
    xn = _layernorm(x_ref[...].astype(jnp.float32), g_ref[...], b_ref[...])
    o_ref[...] = (jnp.dot(xn.astype(jnp.bfloat16), w_ref[...],
                          preferred_element_type=jnp.float32) + bias_ref[...])


# ----------------------------------------------------------------------------
# pallas_call wrappers
# ----------------------------------------------------------------------------
def decoder_layer(y, lp, *, nhead, batch, nt, tile, vmem_limit):
    """One post-norm decoder block. y: flat (B*Lp, D) bf16."""
    N, D = y.shape
    dh = D // nhead

    # ---- fused QKV projection (flat grid over B*Lp) ----
    q, k, v = pl.pallas_call(
        qkv_proj_kernel,
        out_shape=(jax.ShapeDtypeStruct((N, D), jnp.bfloat16),) * 3,
        grid=(N // tile,),
        in_specs=[pl.BlockSpec((tile, D), lambda i: (i, 0)),
                  _const_spec(lp['w_in']), _const_spec(lp['b_in'])],
        out_specs=(pl.BlockSpec((tile, D), lambda i: (i, 0)),) * 3,
        compiler_params=pltpu.CompilerParams(
            dimension_semantics=("parallel",),
            vmem_limit_bytes=vmem_limit),
    )(y, lp['w_in'], lp['b_in'])

    # ---- flash attention + out-proj + LN1 + FFN + LN2 ----
    aux = [lp['w_out'], lp['b_out'], lp['ln1_g'], lp['ln1_b'],
           lp['w1'], lp['b1'], lp['w2'], lp['b2'], lp['ln2_g'], lp['ln2_b']]

    out = pl.pallas_call(
        functools.partial(attn_block_kernel, nhead=nhead),
        out_shape=jax.ShapeDtypeStruct((N, D), jnp.bfloat16),
        grid=(batch, nt, nt),
        in_specs=[pl.BlockSpec((tile, D), lambda b, qi, ki: (b * nt + qi, 0)),   # x
                  pl.BlockSpec((tile, D), lambda b, qi, ki: (b * nt + qi, 0)),   # q
                  # K/V clamped to the causal region: ki>qi re-uses the qi
                  # block index -> no fresh DMA for fully-masked tiles.
                  pl.BlockSpec((tile, D),
                               lambda b, qi, ki: (b * nt + jnp.minimum(ki, qi), 0)),
                  pl.BlockSpec((tile, D),
                               lambda b, qi, ki: (b * nt + jnp.minimum(ki, qi), 0))]
                 + [_const_spec(a) for a in aux],
        out_specs=pl.BlockSpec((tile, D), lambda b, qi, ki: (b * nt + qi, 0)),
        scratch_shapes=[pltpu.VMEM((nhead, tile, 1), jnp.float32),   # m
                        pltpu.VMEM((nhead, tile, 1), jnp.float32),   # l
                        pltpu.VMEM((nhead, tile, dh), jnp.float32)], # acc
        compiler_params=pltpu.CompilerParams(
            dimension_semantics=("parallel", "parallel", "arbitrary"),
            vmem_limit_bytes=vmem_limit),
    )(y, q, k, v, *aux)
    return out


def out_head(y, params, *, tile, vmem_limit):
    N, D = y.shape
    w_p = params['w_out_lin_p']
    b_p = params['b_out_lin_p']
    out_pad = w_p.shape[1]
    aux = [params['out_norm_g'], params['out_norm_b'], w_p, b_p]
    return pl.pallas_call(
        out_head_kernel,
        out_shape=jax.ShapeDtypeStruct((N, out_pad), jnp.float32),
        grid=(N // tile,),
        in_specs=[pl.BlockSpec((tile, D), lambda i: (i, 0))]
                 + [_const_spec(a) for a in aux],
        out_specs=pl.BlockSpec((tile, out_pad), lambda i: (i, 0)),
        compiler_params=pltpu.CompilerParams(
            dimension_semantics=("parallel",),
            vmem_limit_bytes=vmem_limit),
    )(y, *aux)


# ----------------------------------------------------------------------------
# One-time parameter preparation (casts / splits / pads / scale fold).
# ----------------------------------------------------------------------------
def prepare_params(params, *, nhead):
    D = params['emb'].shape[1]
    dh = D // nhead
    scale = 1.0 / math.sqrt(dh)
    # Fold the 1/sqrt(dh) q-scale into the Q columns of w_in/b_in.
    col_scale = jnp.concatenate([jnp.full((D,), scale, jnp.float32),
                                 jnp.ones((2 * D,), jnp.float32)])

    layers = []
    for lp in params['layers']:
        layers.append(dict(
            w_in=(lp['w_in'] * col_scale[None, :]).astype(jnp.bfloat16),
            b_in=lp['b_in'] * col_scale[None, :],
            w_out=lp['w_out'].astype(jnp.bfloat16), b_out=lp['b_out'],
            ln1_g=lp['ln1_g'], ln1_b=lp['ln1_b'],
            w1=lp['w1'].astype(jnp.bfloat16), b1=lp['b1'],
            w2=lp['w2'].astype(jnp.bfloat16), b2=lp['b2'],
            ln2_g=lp['ln2_g'], ln2_b=lp['ln2_b']))

    out_dim = params['w_out_lin'].shape[1]
    out_pad = _round_up(max(out_dim, 128), 128)              # lane-dense slab
    w_p = (jnp.zeros((D, out_pad), jnp.float32)
           .at[:, :out_dim].set(params['w_out_lin']).astype(jnp.bfloat16))
    b_p = jnp.zeros((1, out_pad), jnp.float32).at[:, :out_dim].set(
        params['b_out_lin'])

    prepared = dict(params)
    prepared['layers'] = layers
    prepared['w_out_lin_p'] = w_p
    prepared['b_out_lin_p'] = b_p
    return prepared


# ----------------------------------------------------------------------------
# Full forward (glue in plain JAX, hot path in Pallas)
# ----------------------------------------------------------------------------
def forward(params, x, *, nhead, seq_tile=256):
    """x: (B, C, H, W) int32 tokens -> (B, C, H, W, output_dim) float32.

    `params` must come from prepare_params().
    """
    B, C, H, W = x.shape
    D = params['emb'].shape[1]
    L = C * H * W
    out_dim = params['w_out_lin'].shape[1]
    vmem_limit = _vmem_limit_bytes()

    # encode: Embedding + PositionalEncodingImage
    h = params['emb'][x]                                     # (B, C, H, W, D)
    h = h + params['enc_c'] + params['enc_h'] + params['enc_w']

    # im2seq 'cwh': channel fastest, then width, then height -> (L, B, D)
    s = jnp.transpose(h, (2, 3, 1, 0, 4)).reshape(L, B, D)

    # AutoregressiveShift: prepend learned first token, drop last position
    first = jnp.broadcast_to(params['first_token'], (1, B, D))
    s = jnp.concatenate([first, s[:-1]], axis=0)

    # Kernel layout: flat (B*Lp, D) bf16 residual stream, tile a multiple of 16
    # (bf16 sublane pack); use 128/256+ tiles for realistic L.
    y = jnp.transpose(s, (1, 0, 2))                          # (B, L, D)
    tile = _round_up(min(seq_tile, L), 16)
    Lp = _round_up(L, tile)
    if Lp != L:
        y = jnp.pad(y, ((0, 0), (0, Lp - L), (0, 0)))        # causal mask keeps real rows exact
    nt = Lp // tile
    y = y.reshape(B * Lp, D).astype(jnp.bfloat16)

    for lp in params['layers']:
        y = decoder_layer(y, lp, nhead=nhead, batch=B, nt=nt, tile=tile,
                          vmem_limit=vmem_limit)

    y = out_head(y, params, tile=tile, vmem_limit=vmem_limit)  # (B*Lp, out_pad) f32
    y = y.reshape(B, Lp, -1)[:, :L, :out_dim]                # drop seq + lane padding

    # seq2im (inverse of the 'cwh' ordering)
    s = jnp.transpose(y, (1, 0, 2))                          # (L, B, out)
    im = s.reshape(H, W, C, B, -1)
    im = jnp.transpose(im, (3, 2, 0, 1, 4))                  # (B, C, H, W, out)
    return im                                                # out_lambda = identity


# ----------------------------------------------------------------------------
# Deterministic synthetic parameter init (shapes follow the torch module)
# ----------------------------------------------------------------------------
def init_params(key, *, image_shape, num_bits, d_model, num_layers,
                dim_ff, output_dim):
    C, H, W = image_shape
    keys = iter(jax.random.split(key, 6 + 4 * num_layers))

    def nrm(shape, s=0.1):
        return s * jax.random.normal(next(keys), shape, jnp.float32)

    params = dict(
        emb=nrm((2 ** num_bits, d_model)),
        enc_c=nrm((1, C, 1, 1, d_model), 0.02),
        enc_h=nrm((1, 1, H, 1, d_model), 0.02),
        enc_w=nrm((1, 1, 1, W, d_model), 0.02),
        first_token=nrm((1, 1, d_model)),
        out_norm_g=jnp.ones((1, d_model), jnp.float32),
        out_norm_b=jnp.zeros((1, d_model), jnp.float32),
        w_out_lin=nrm((d_model, output_dim)),                # Linear weight^T
        b_out_lin=jnp.zeros((1, output_dim), jnp.float32),
        layers=[],
    )
    for _ in range(num_layers):
        params['layers'].append(dict(
            w_in=nrm((d_model, 3 * d_model)),                # in_proj_weight^T
            b_in=jnp.zeros((1, 3 * d_model), jnp.float32),
            w_out=nrm((d_model, d_model)),                   # out_proj.weight^T
            b_out=jnp.zeros((1, d_model), jnp.float32),
            ln1_g=jnp.ones((1, d_model), jnp.float32),
            ln1_b=jnp.zeros((1, d_model), jnp.float32),
            w1=nrm((d_model, dim_ff)),                       # linear1.weight^T
            b1=jnp.zeros((1, dim_ff), jnp.float32),
            w2=nrm((dim_ff, d_model)),                       # linear2.weight^T
            b2=jnp.zeros((1, d_model), jnp.float32),
            ln2_g=jnp.ones((1, d_model), jnp.float32),
            ln2_b=jnp.zeros((1, d_model), jnp.float32),
        ))
    return params


if __name__ == "__main__":
    # Small, module-consistent shapes.
    B = 2
    image_shape = (3, 4, 4)        # (C, H, W) -> sequence length L = 48
    num_bits = 2                   # vocab size 4
    d_model = 32
    nhead = 4
    num_layers = 2
    dim_feedforward = 64
    output_dim = 8

    key = jax.random.PRNGKey(0)
    k_params, k_x = jax.random.split(key)
    params = init_params(k_params, image_shape=image_shape, num_bits=num_bits,
                         d_model=d_model, num_layers=num_layers,
                         dim_ff=dim_feedforward, output_dim=output_dim)
    prepared = prepare_params(params, nhead=nhead)

    x = jax.random.randint(k_x, (B,) + image_shape, 0, 2 ** num_bits,
                           dtype=jnp.int32)

    # seq_tile=32 exercises multi-tile flash attention at demo scale
    # (L=48 -> Lp=64, 2 query tiles x 2 kv tiles incl. one skipped causal tile);
    # use 128-512 for realistic sequence lengths.
    out = forward(prepared, x, nhead=nhead, seq_tile=32)
    out = jax.block_until_ready(out)
    assert out.shape == (B,) + image_shape + (output_dim,), out.shape
    assert bool(jnp.all(jnp.isfinite(out)))
    print("KERNEL_OK")
</pallas_src>

<mosaic_0001>
module attributes {stable_mosaic.version = 11 : i64} {
  func.func @_probe_kernel(%arg0: i32, %arg1: memref<8x128xf32, #tpu.memory_space<vmem>>, %arg2: memref<8x128xf32, #tpu.memory_space<vmem>>) attributes {dimension_semantics = [#tpu.dimension_semantics<arbitrary>], iteration_bounds = array<i64: 2>, scalar_prefetch = 0 : i64, scratch_operands = 0 : i64, tpu.core_type = #tpu.core_type<tc>, window_params = [{pipeline_mode = #tpu.pipeline_mode<synchronous>, transform_indices = @transform_0, window_bounds = array<i64: 8, 128>}, {pipeline_mode = #tpu.pipeline_mode<synchronous>, transform_indices = @transform_1, window_bounds = array<i64: 8, 128>}]} {
    %c0 = arith.constant 0 : index
    %c0_0 = arith.constant 0 : index
    %0 = vector.load %arg1[%c0, %c0_0] : memref<8x128xf32, #tpu.memory_space<vmem>>, vector<8x128xf32>
    %cst = arith.constant 2.000000e+00 : f32
    %1 = vector.broadcast %cst : f32 to vector<8x128xf32>
    %2 = arith.mulf %0, %1 : vector<8x128xf32>
    %c0_1 = arith.constant 0 : index
    %c0_2 = arith.constant 0 : index
    %3 = vector.load %arg2[%c0_1, %c0_2] : memref<8x128xf32, #tpu.memory_space<vmem>>, vector<8x128xf32>
    tpu.vector_store %arg2[%c0_1, %c0_2], %2 {strides = array<i32>} : memref<8x128xf32, #tpu.memory_space<vmem>>, vector<8x128xf32>,
    return
  }
  func.func @transform_0(%arg0: i32) -> (i32, i32) {
    %c0_i32 = arith.constant 0 : i32
    %c0_i32_0 = arith.constant 0 : i32
    %c0_i32_1 = arith.constant 0 : i32
    return %c0_i32, %c0_i32_0 : i32, i32
  }
  func.func @transform_1(%arg0: i32) -> (i32, i32) {
    %c0_i32 = arith.constant 0 : i32
    %c0_i32_0 = arith.constant 0 : i32
    %c0_i32_1 = arith.constant 0 : i32
    return %c0_i32, %c0_i32_0 : i32, i32
  }
}

module attributes {stable_mosaic.version = 11 : i64} {
  func.func @qkv_proj_kernel(%arg0: i32, %arg1: memref<32x32xbf16, #tpu.memory_space<vmem>>, %arg2: memref<32x96xbf16, #tpu.memory_space<vmem>>, %arg3: memref<1x96xf32, #tpu.memory_space<vmem>>, %arg4: memref<32x32xbf16, #tpu.memory_space<vmem>>, %arg5: memref<32x32xbf16, #tpu.memory_space<vmem>>, %arg6: memref<32x32xbf16, #tpu.memory_space<vmem>>) attributes {dimension_semantics = [#tpu.dimension_semantics<parallel>], iteration_bounds = array<i64: 4>, scalar_prefetch = 0 : i64, scratch_operands = 0 : i64, tpu.core_type = #tpu.core_type<tc>, window_params = [{transform_indices = @transform_0, window_bounds = array<i64: 32, 32>}, {pipeline_mode = #tpu.pipeline_mode<synchronous>, transform_indices = @transform_1, window_bounds = array<i64: 32, 96>}, {pipeline_mode = #tpu.pipeline_mode<synchronous>, transform_indices = @transform_2, window_bounds = array<i64: 1, 96>}, {transform_indices = @transform_3, window_bounds = array<i64: 32, 32>}, {transform_indices = @transform_4, window_bounds = array<i64: 32, 32>}, {transform_indices = @transform_5, window_bounds = array<i64: 32, 32>}]} {
    %c0 = arith.constant 0 : index
    %c0_0 = arith.constant 0 : index
    %0 = vector.load %arg1[%c0, %c0_0] : memref<32x32xbf16, #tpu.memory_space<vmem>>, vector<32x32xbf16>
    %c0_1 = arith.constant 0 : index
    %c0_2 = arith.constant 0 : index
    %1 = vector.load %arg2[%c0_1, %c0_2] : memref<32x96xbf16, #tpu.memory_space<vmem>>, vector<32x96xbf16>
    %cst = arith.constant dense<0.000000e+00> : vector<32x96xf32>
    %2 = tpu.matmul %0, %1, %cst {dimension_numbers = #tpu.dot_dimension_numbers<[1], [0], [0], [1], [0, 0, 1, 1], [], []>} : vector<32x32xbf16>, vector<32x96xbf16>, vector<32x96xf32> -> vector<32x96xf32>
    %c0_3 = arith.constant 0 : index
    %c0_4 = arith.constant 0 : index
    %3 = vector.load %arg3[%c0_3, %c0_4] : memref<1x96xf32, #tpu.memory_space<vmem>>, vector<1x96xf32>
    %4 = vector.broadcast %3 : vector<1x96xf32> to vector<32x96xf32>
    %5 = arith.addf %2, %4 : vector<32x96xf32>
    %6 = vector.extract_strided_slice %5 {offsets = [0, 0], sizes = [32, 32], strides = [1, 1]} : vector<32x96xf32> to vector<32x32xf32>
    %7 = arith.truncf %6 : vector<32x32xf32> to vector<32x32xbf16>
    %c0_5 = arith.constant 0 : index
    %c0_6 = arith.constant 0 : index
    %8 = vector.load %arg4[%c0_5, %c0_6] : memref<32x32xbf16, #tpu.memory_space<vmem>>, vector<32x32xbf16>
    tpu.vector_store %arg4[%c0_5, %c0_6], %7 {strides = array<i32>} : memref<32x32xbf16, #tpu.memory_space<vmem>>, vector<32x32xbf16>,
    %9 = vector.extract_strided_slice %5 {offsets = [0, 32], sizes = [32, 32], strides = [1, 1]} : vector<32x96xf32> to vector<32x32xf32>
    %10 = arith.truncf %9 : vector<32x32xf32> to vector<32x32xbf16>
    %c0_7 = arith.constant 0 : index
    %c0_8 = arith.constant 0 : index
    %11 = vector.load %arg5[%c0_7, %c0_8] : memref<32x32xbf16, #tpu.memory_space<vmem>>, vector<32x32xbf16>
    tpu.vector_store %arg5[%c0_7, %c0_8], %10 {strides = array<i32>} : memref<32x32xbf16, #tpu.memory_space<vmem>>, vector<32x32xbf16>,
    %12 = vector.extract_strided_slice %5 {offsets = [0, 64], sizes = [32, 32], strides = [1, 1]} : vector<32x96xf32> to vector<32x32xf32>
    %13 = arith.truncf %12 : vector<32x32xf32> to vector<32x32xbf16>
    %c0_9 = arith.constant 0 : index
    %c0_10 = arith.constant 0 : index
    %14 = vector.load %arg6[%c0_9, %c0_10] : memref<32x32xbf16, #tpu.memory_space<vmem>>, vector<32x32xbf16>
    tpu.vector_store %arg6[%c0_9, %c0_10], %13 {strides = array<i32>} : memref<32x32xbf16, #tpu.memory_space<vmem>>, vector<32x32xbf16>,
    return
  }
  func.func @transform_0(%arg0: i32) -> (i32, i32) {
    %c0_i32 = arith.constant 0 : i32
    %c0_i32_0 = arith.constant 0 : i32
    return %arg0, %c0_i32 : i32, i32
  }
  func.func @transform_1(%arg0: i32) -> (i32, i32) {
    %c0_i32 = arith.constant 0 : i32
    %c0_i32_0 = arith.constant 0 : i32
    %c0_i32_1 = arith.constant 0 : i32
    return %c0_i32, %c0_i32_0 : i32, i32
  }
  func.func @transform_2(%arg0: i32) -> (i32, i32) {
    %c0_i32 = arith.constant 0 : i32
    %c0_i32_0 = arith.constant 0 : i32
    %c0_i32_1 = arith.constant 0 : i32
    return %c0_i32, %c0_i32_0 : i32, i32
  }
  func.func @transform_3(%arg0: i32) -> (i32, i32) {
    %c0_i32 = arith.constant 0 : i32
    %c0_i32_0 = arith.constant 0 : i32
    return %arg0, %c0_i32 : i32, i32
  }
  func.func @transform_4(%arg0: i32) -> (i32, i32) {
    %c0_i32 = arith.constant 0 : i32
    %c0_i32_0 = arith.constant 0 : i32
    return %arg0, %c0_i32 : i32, i32
  }
  func.func @transform_5(%arg0: i32) -> (i32, i32) {
    %c0_i32 = arith.constant 0 : i32
    %c0_i32_0 = arith.constant 0 : i32
    return %arg0, %c0_i32 : i32, i32
  }
}

</mosaic_0001>

<bundles_post_ra>
// kernel: tpu_custom_call.1
= control target key start
LH: loop header
LB: loop body
LE: loop exit
PB: predicated region body
PF: predicated region fallthrough
CT: control target
= control target key end

     0   :  { %6 = vsyncpa [#allocation3], 0  ;;  %s305_s0 = inlined_call_operand.hbm [shape: f32[8,128], index: 0, kind: input, shape index: {}]   ;;  %s306_s1 = inlined_call_operand.hbm [shape: f32[8,128], index: 1, kind: output, shape index: {}]  }
   0x1   :  { %7 = vsyncpa [#allocation4], 0  ;;  %s258_s6 = smov 0  }
   0x2 LB: > { %s145_s7 = sadd.s32 4294967295, %s244_s6   ;;  %p146_p0 = scmp.ge.s32.totalorder %s244_s6, 1  ;;  %s244_s6 = sphi %s258_s6, %s13_s6  }
   0x3   : > { %p60_p1 = scmp.lt.s32.totalorder %s244_s6, 3  ;;  %p270_p3 = scmp.eq.s32.totalorder %s145_s7, 0 }
   0x4   : > { %s246_s10 = smov [#allocation2]  }
   0x5   : > { %p266_p2 = pnand %p146_p0, %p60_p1  ;;  %s73_s11 = sshll.u32 %s246_s10, 4  ;;  %s74_s11 = int_to_ptr.vmem [resolvable:$true] %s73_s11 }
   0x6   : > { %s191_s12 = scalar_lea.vmem %s74_s11, 128  ;;  %p199_p10 = scmp.lt.s32.totalorder %s74_s11, %s74_s11 }
   0x7   : > { %p162_p4 = pneg %p266_p2  ;;  %p192_p7 = scmp.ne.s32.totalorder %s74_s11, %s191_s12 }
   0x8   : > { %p200_p11 = scmp.lt.s32.totalorder %s191_s12, %s191_s12 }
   0x9   : > { %p163_p5 = pnand %p270_p3, %p162_p4 }
   0xa   : > { %p201_p12 = por %p200_p11, %p199_p10 }
   0xb   : > { %p182_p6 = pneg %p163_p5 }
   0xd   : > { %p194_p8 = pnand %p192_p7, %p182_p6 }
   0xf   : > { %p195_p9 = pneg %p194_p8 }
  0x11   : > { %p202_p13 = pnand %p201_p12, %p195_p9 }
  0x13   : > { %205 = shalt.err (!%p202_p13)
}
  0x14   : > { %165 = dma.hbm_to_vmem [thread:$0]  (!%p163_p5), %s305_s0, 128, %s74_s11, [#allocation3]  }
  0x15   : > { %86 = sbr.rel (%p266_p2) target bundleno = 42 (0x2a), region = 24 }
  0x1a   : > { %235 = dma.done.wait (%p270_p3), [#allocation3], 128  }
  0x1b   : > { %237 = vsyncadd (%p270_p3), [#allocation3], 4294967168  ;;  %s247_s15 = smov [#allocation5]   ;;  %v96_v0 = vld [vmem:[#allocation2] sm:$0xff]  ;;  %p287_p0 = scmp.eq.s32.totalorder %s145_s7, 1 }
  0x1c   : > { %s106_s16 = sshll.u32 %s247_s15, 4  ;;  %v97_v1 = vmul.f32 2.0, %v96_v0  ;;  %s107_s16 = int_to_ptr.vmem [resolvable:$true] %s106_s16 }
  0x1d   : > { %s206_s18 = scalar_lea.vmem %s107_s16, 128  ;;  %p213_p5 = scmp.lt.s32.totalorder %s107_s16, %s107_s16 }
  0x1e   : > { %98 = vst [vmem:[#allocation5] sm:$0xff] %v97_v1  ;;  %p207_p1 = scmp.ne.s32.totalorder %s107_s16, %s206_s18  ;;  %p214_p6 = scmp.lt.s32.totalorder %s206_s18, %s206_s18 }
  0x20   : > { %p208_p2 = pnand %p207_p1, %p287_p0  ;;  %p215_p7 = por %p214_p6, %p213_p5 }
  0x22   : > { %p209_p4 = pneg %p208_p2 }
  0x24   : > { %p216_p3 = pnand %p215_p7, %p209_p4 }
  0x26   : > { %219 = shalt.err (!%p216_p3)
}
  0x27   : > { %159 = dma.vmem_to_hbm [thread:$0]  (%p287_p0), %s107_s16, 128, %s306_s1, [#allocation4]  }
  0x28   : > { %239 = dma.done.wait (%p287_p0), [#allocation4], 128  }
  0x29   : > { %241 = vsyncadd (%p287_p0), [#allocation4], 4294967168 }
  0x2a PF: > { %s13_s6 = sadd.s32 1, %s244_s6  }
  0x2b   : > { %p10_p8 = scmp.ge.s32.totalorder %s13_s6, 4  }
  0x2d   :  { %12 = sbr.rel (!%p10_p8) target bundleno = 2 (0x2), region = 53 }
  0x32   :  { %119 = vsyncpa [#allocation3], 1 }
  0x33   :  { %121 = vsyncpa [#allocation3 + $0x1], 1 }
  0x34   :  { %122 = vsyncpa [#allocation4], 1 }
  0x35   :  { %124 = vsyncpa [#allocation4 + $0x1], 1 }

// kernel: tpu_custom_call.1
= control target key start
LH: loop header
LB: loop body
LE: loop exit
PB: predicated region body
PF: predicated region fallthrough
CT: control target
= control target key end

     0   :  { %s622_s18 = smov 0   ;;  %s672_s0 = inlined_call_operand.vmem [shape: bf16[128,32], index: 0, kind: input, shape index: {}]   ;;  %s673_s1 = inlined_call_operand.vmem [shape: bf16[32,96], index: 1, kind: input, shape index: {}]   ;;  %s674_s2 = inlined_call_operand.vmem [shape: f32[1,96], index: 2, kind: input, shape index: {}]   ;;  %s675_s3 = inlined_call_operand.vmem [shape: bf16[128,32], index: 3, kind: output, shape index: {0}]   ;;  %s676_s4 = inlined_call_operand.vmem [shape: bf16[128,32], index: 4, kind: output, shape index: {1}]   ;;  %s677_s5 = inlined_call_operand.vmem [shape: bf16[128,32], index: 5, kind: output, shape index: {2}]  }
   0x1 LB: > { %s526_s19 = sadd.s32 4294967295, %s588_s18   ;;  %p530_p0 = scmp.ge.s32.totalorder %s588_s18, 1  ;;  %s588_s18 = sphi %s622_s18, %s16_s18  }
   0x2   : > { %p193_p1 = scmp.lt.s32.totalorder %s588_s18, 5 }
   0x4   : > { %p194_p2 = pnand %p530_p0, %p193_p1 }
   0x5   : > { %s531_s22 = sshll.u32 (!%p194_p2), %s526_s19, 2  ;;  %s590_s9 = smov (!%p194_p2), 96  }
   0x6   : > { %197 = sbr.rel (%p194_p2) target bundleno = 347 (0x15b), region = 32  ;;  %p232_p3 = scmp.lt.s32.totalorder (!%p194_p2), %s531_s22, 15 }
   0x7   : > { %s591_s10 = smov (!%p194_p2), 64  }
   0xb   : > { %v578_v0 = vld [vmem:[%s673_s1 + $0x8] sm:$0xff]   ;;  %v579_v1 = vld [vmem:[%s673_s1] sm:$0xff]   ;;  %s679_s22 = smov (!%p232_p3, %s531_s22), 15  ;;  %vm293_vm0 = vcmask 261120   ;;  %vm365_vm1 = vcmask 257024  }
   0xc   : > { %560 = vmatprep.subr.bf16.mxu0 %v578_v0  ;;  %s636_s25 = sshll.u32 %s679_s22, 2  ;;  %v539_v4 = vld [vmem:[%s674_s2] ss:$0 sm:$0xff] }
   0xd   : > { %561 = vmatpush3.bf16.msra.mxu0 %v578_v0  ;;  %s235_s28 = scalar_lea.vmem %s672_s0, %s636_s25  ;;  %s241_s8 = scalar_lea.vmem %s675_s3, %s636_s25 }
   0xe   : > { %562 = vmatprep.subr.bf16.mxu0 %v579_v1  ;;  %v580_v2 = vld [vmem:[%s235_s28] sm:$0xff]   ;;  %v581_v3 = vld [vmem:[%s235_s28 + $0x8] sm:$0xff]   ;;  %s247_s13 = scalar_lea.vmem %s676_s4, %s636_s25  ;;  %s253_s16 = scalar_lea.vmem %s677_s5, %s636_s25 }
   0xf   : > { %564 = vmatprep.mubr.msk.bf16.mxu0 %vm293_vm0, %v580_v2 }
  0x11   : > { %563 = vmatpush3.bf16.msra.mxu0 %v579_v1 }
  0x14   : > { %565 = vmatmul.mubr.msk.bf16.vlgmr.msra.gmra.mxu0 %vm293_vm0, %v581_v3 }
  0xd4   : > { %v566_v5 = vpop.f32.mrf.mxu0 }
  0xd5   : > { %v343_v6 = vadd.f32 %v566_v5, %v539_v4 }
  0xd6   : > { %v334_v7 = vpop.f32.mrf.mxu0 }
  0xd7   : > { %v554_v8 = vpack.c.bf16 %v343_v6, %v343_v6  ;;  %v335_v9 = vadd.f32 %v539_v4, %v334_v7 }
  0xd8   : > { %v567_v10 = vpop.f32.mrf.mxu0 }
  0xd9   : > { %368 = vst.msk [vmem:[%s241_s8 + $0x8] sm:$0xf] %vm365_vm1, %v554_v8  ;;  %v552_v11 = vpack.c.bf16 %v335_v9, %v335_v9  ;;  %v346_v12 = vadd.f32 %v567_v10, %v539_v4  ;;  %374 = vrot.lane.b32.xlu1 %v554_v8, %s590_s9 }
  0xda   : > { %v337_v13 = vpop.f32.mrf.mxu0 }
  0xdb   : > { %366 = vst.msk [vmem:[%s241_s8] sm:$0xf] %vm365_vm1, %v552_v11  ;;  %v555_v14 = vpack.c.bf16 %v346_v12, %v346_v12  ;;  %v338_v15 = vadd.f32 %v539_v4, %v337_v13  ;;  %370 = vrot.lane.b32.xlu0 %v552_v11, %s590_s9 }
  0xdd   : > { %369 = vst.msk [vmem:[%s241_s8 + $0xc] sm:$0xf] %vm365_vm1, %v555_v14  ;;  %v553_v16 = vpack.c.bf16 %v338_v15, %v338_v15  ;;  %376 = vrot.lane.b32.xlu1 %v555_v14, %s590_s9 }
  0xdf   : > { %367 = vst.msk [vmem:[%s241_s8 + $0x4] sm:$0xf] %vm365_vm1, %v553_v16  ;;  %386 = vrot.lane.b32.xlu0 %v552_v11, %s591_s10 }
  0xe1   : > { %388 = vrot.lane.b32.xlu1 %v553_v16, %s591_s10 }
  0xe3   : > { %372 = vrot.lane.b32.xlu0 %v553_v16, %s590_s9 }
  0xe5   : > { %392 = vrot.lane.b32.xlu1 %v555_v14, %s591_s10 }
  0xe7   : > { %390 = vrot.lane.b32.xlu0 %v554_v8, %s591_s10 }
 0x14b   : > { %v375_v17 = vpop.permute.xlu1 %374 }
 0x14c   : > { %384 = vst.msk [vmem:[%s247_s13 + $0x8] sm:$0xf] %vm365_vm1, %v375_v17 }
 0x14d   : > { %v371_v18 = vpop.permute.xlu0 %370 }
 0x14e   : > { %382 = vst.msk [vmem:[%s247_s13] sm:$0xf] %vm365_vm1, %v371_v18 }
 0x14f   : > { %v377_v19 = vpop.permute.xlu1 %376 }
 0x150   : > { %385 = vst.msk [vmem:[%s247_s13 + $0xc] sm:$0xf] %vm365_vm1, %v377_v19 }
 0x151   : > { %v387_v20 = vpop.permute.xlu0 %386 }
 0x152   : > { %398 = vst.msk [vmem:[%s253_s16] sm:$0xf] %vm365_vm1, %v387_v20 }
 0x153   : > { %v389_v21 = vpop.permute.xlu1 %388 }
 0x154   : > { %399 = vst.msk [vmem:[%s253_s16 + $0x4] sm:$0xf] %vm365_vm1, %v389_v21 }
 0x155   : > { %v373_v22 = vpop.permute.xlu0 %372 }
 0x156   : > { %383 = vst.msk [vmem:[%s247_s13 + $0x4] sm:$0xf] %vm365_vm1, %v373_v22 }
 0x157   : > { %v393_v23 = vpop.permute.xlu1 %392 }
 0x158   : > { %401 = vst.msk [vmem:[%s253_s16 + $0xc] sm:$0xf] %vm365_vm1, %v393_v23 }
 0x159   : > { %v391_v24 = vpop.permute.xlu0 %390 }
 0x15a   : > { %400 = vst.msk [vmem:[%s253_s16 + $0x8] sm:$0xf] %vm365_vm1, %v391_v24 }
 0x15b PF: > { %s16_s18 = sadd.s32 1, %s588_s18  }
 0x15c   : > { %p13_p4 = scmp.ge.s32.totalorder %s16_s18, 6  }
 0x15e   :  { %15 = sbr.rel (!%p13_p4) target bundleno = 1 (0x1), region = 86 }

</bundles_post_ra>
